<compile_context>
chip_gen: v7x
topology: tpu7x:2x2x1
jax: 0.10.0
libtpu: 0.0.40
codegen_flags: <defaults>
</compile_context>

<pallas_src>
import functools
import math

import jax
import jax.numpy as jnp
from jax import lax
from jax.experimental import pallas as pl
from jax.experimental.pallas import tpu as pltpu


def sdpa_kernel(q_ref, k_ref, v_ref, mask_ref, ctx_ref, attn_ref, *, inv_sqrt_dk):
    # Blocks: q (G, TQ, D), k/v (G, Sk, D), mask (G, TQ, Sk) in its native dtype.
    q = q_ref[...]
    k = k_ref[...]
    v = v_ref[...]
    m = mask_ref[...]

    # scores = Q @ K^T, batched over the packed (batch*head) dim G,
    # contraction on the last dims (no explicit K transpose), f32 MXU accumulation.
    scores = lax.dot_general(
        q, k,
        dimension_numbers=(((2,), (2,)), ((0,), (0,))),
        preferred_element_type=jnp.float32,
    )  # (G, TQ, Sk) f32
    scores = scores * jnp.float32(inv_sqrt_dk)

    # masked_fill_(mask, -1e20); compare on the native mask dtype in-kernel.
    masked = m if m.dtype == jnp.bool_ else (m != 0)
    scores = jnp.where(masked, jnp.float32(-1e20), scores)

    # Numerically stable softmax over the last axis (matches nn.Softmax(dim=-1)).
    scores = scores - jnp.max(scores, axis=-1, keepdims=True)
    e = jnp.exp(scores)
    attn = e / jnp.sum(e, axis=-1, keepdims=True)   # exact denom (user-visible)

    attn_ref[...] = attn.astype(attn_ref.dtype)

    # context = attention @ V (batched over G), f32 accumulation.
    # Probabilities stay in V's dtype; a bf16 downcast of P for f32 inputs is a
    # possible speedup but changes numerics, so it is left out by default.
    ctx = lax.dot_general(
        attn.astype(v.dtype), v,
        dimension_numbers=(((2,), (1,)), ((0,), (0,))),
        preferred_element_type=jnp.float32,
    )  # (G, TQ, D)
    ctx_ref[...] = ctx.astype(ctx_ref.dtype)


def _vmem_capacity_bytes():
    """Physical per-core VMEM; conservative 64 MiB fallback if unqueryable."""
    try:
        return int(pltpu.get_tpu_info().vmem_capacity_bytes)
    except Exception:
        return 64 * 1024 * 1024


def _choose_q_tile(sq):
    if sq <= 512:
        return sq
    for cand in (512, 256, 128):
        if sq % cand == 0:
            return cand
    # Long, non-divisible Sq: fixed tile + cdiv grid (edge block is partial;
    # out-of-bounds writes are dropped), never fall back to tq == Sq.
    return 256


def _block_bytes(g, tq, sk, d, in_itemsize, out_itemsize, mask_itemsize):
    q_blk = g * tq * d * in_itemsize
    kv_blk = 2 * g * sk * d * in_itemsize
    mask_blk = g * tq * sk * mask_itemsize
    ctx_blk = g * tq * d * out_itemsize
    attn_blk = g * tq * sk * out_itemsize
    # In/out blocks are double-buffered by the pipeline; the softmax needs
    # ~3 score-sized f32 temporaries (scores, exp, attn before cast).
    return 2 * (q_blk + kv_blk + mask_blk + ctx_blk + attn_blk) + 3 * g * tq * sk * 4


def _choose_bh_pack(bh, n_q_tiles, tq, sk, d, in_itemsize, out_itemsize,
                    mask_itemsize, budget_bytes):
    """Largest G dividing BH that fits the VMEM block budget, preferring to
    keep >=4 (else >=2) total grid steps across BOTH parallel axes (megacore)."""
    divisors = [g for g in range(1, bh + 1) if bh % g == 0]
    fits = [g for g in sorted(divisors, reverse=True)
            if _block_bytes(g, tq, sk, d, in_itemsize, out_itemsize,
                            mask_itemsize) <= budget_bytes]
    if not fits:
        return 1
    for min_steps in (4, 2):
        pref = [g for g in fits if (bh // g) * n_q_tiles >= min_steps]
        if pref:
            return pref[0]
    return fits[0]


def scaled_dot_product_attention(Q, K, V, attention_mask):
    """Pallas equivalent of ScaledDotProductAttention.forward.

    Q: [B, H, Sq, D], K: [B, H, Sk, D], V: [B, H, Sk, D]
    attention_mask: [B, H, Sq, Sk] (bool / int; nonzero == masked out)
    Returns (context [B, H, Sq, D], attention [B, H, Sq, Sk]).
    """
    assert Q.shape[-1] == K.shape[-1], "Q, K feature dims must match"
    assert K.shape[-1] == V.shape[-1], "K, V feature dims must match"
    assert K.shape[-2] == V.shape[-2], "K, V sequence lengths must match"
    assert (Q.shape[-2] == attention_mask.shape[-2]
            and K.shape[-2] == attention_mask.shape[-1]), "attention_mask shape mismatch"

    B, H, Sq, D = Q.shape
    Sk = K.shape[-2]
    BH = B * H

    out_dtype = Q.dtype  # keep native precision; dots accumulate in f32 anyway

    q = Q.reshape(BH, Sq, D)
    k = K.reshape(BH, Sk, D)
    v = V.reshape(BH, Sk, D)
    # Feed the mask in its native dtype (bool is already 1 byte) -- no extra
    # wrapper-side conversion pass over the largest read-only input.
    m = attention_mask.reshape(BH, Sq, Sk)

    tq = _choose_q_tile(Sq)
    n_q_tiles = pl.cdiv(Sq, tq)

    # Generation-aware VMEM budgets.
    cap = _vmem_capacity_bytes()
    if cap <= 72 * 1024 * 1024:            # v7x-class: 64 MiB per core
        budget = 14 * 1024 * 1024
        vmem_limit = 40 * 1024 * 1024
    else:                                  # v5e / v6e: 128 MiB
        budget = 56 * 1024 * 1024
        vmem_limit = 96 * 1024 * 1024
    vmem_limit = min(vmem_limit, (cap * 3) // 4)

    in_itemsize = jnp.dtype(q.dtype).itemsize
    out_itemsize = jnp.dtype(out_dtype).itemsize
    mask_itemsize = jnp.dtype(m.dtype).itemsize

    G = _choose_bh_pack(BH, n_q_tiles, tq, Sk, D, in_itemsize, out_itemsize,
                        mask_itemsize, budget)

    # Make sure the limit covers the chosen blocks (plus headroom), capped
    # below physical VMEM.
    need = _block_bytes(G, tq, Sk, D, in_itemsize, out_itemsize, mask_itemsize)
    vmem_limit = min(int(cap * 0.9), max(vmem_limit, need + 4 * 1024 * 1024))

    grid = (BH // G, n_q_tiles)

    kernel = functools.partial(sdpa_kernel, inv_sqrt_dk=1.0 / math.sqrt(D))

    ctx, attn = pl.pallas_call(
        kernel,
        out_shape=(
            jax.ShapeDtypeStruct((BH, Sq, D), out_dtype),
            jax.ShapeDtypeStruct((BH, Sq, Sk), out_dtype),
        ),
        grid=grid,
        in_specs=[
            pl.BlockSpec((G, tq, D), lambda g, i: (g, i, 0)),   # Q tile
            pl.BlockSpec((G, Sk, D), lambda g, i: (g, 0, 0)),   # K (full Sk)
            pl.BlockSpec((G, Sk, D), lambda g, i: (g, 0, 0)),   # V (full Sk)
            pl.BlockSpec((G, tq, Sk), lambda g, i: (g, i, 0)),  # mask tile
        ],
        out_specs=(
            pl.BlockSpec((G, tq, D), lambda g, i: (g, i, 0)),   # context
            pl.BlockSpec((G, tq, Sk), lambda g, i: (g, i, 0)),  # attention
        ),
        compiler_params=pltpu.CompilerParams(
            dimension_semantics=("parallel", "parallel"),
            vmem_limit_bytes=int(vmem_limit),
        ),
    )(q, k, v, m)

    return ctx.reshape(B, H, Sq, D), attn.reshape(B, H, Sq, Sk)


def _reference(Q, K, V, mask):
    d_k = Q.shape[-1]
    scores = jnp.einsum("bhqd,bhkd->bhqk", Q, K,
                        preferred_element_type=jnp.float32) / jnp.sqrt(jnp.float32(d_k))
    scores = jnp.where(mask, jnp.float32(-1e20), scores)
    attn = jax.nn.softmax(scores, axis=-1)
    ctx = jnp.einsum("bhqk,bhkd->bhqd", attn, V)
    return ctx, attn


if __name__ == "__main__":
    key = jax.random.PRNGKey(0)
    kq, kk, kv, km = jax.random.split(key, 4)

    B, H, Sq, Sk, D = 2, 4, 8, 8, 32
    Q = jax.random.normal(kq, (B, H, Sq, D), dtype=jnp.float32)
    K = jax.random.normal(kk, (B, H, Sk, D), dtype=jnp.float32)
    V = jax.random.normal(kv, (B, H, Sk, D), dtype=jnp.float32)
    # Random boolean mask (True = masked out), guaranteed not to mask entire rows.
    mask = jax.random.bernoulli(km, p=0.25, shape=(B, H, Sq, Sk))
    mask = mask.at[..., 0].set(False)

    ctx, attn = scaled_dot_product_attention(Q, K, V, mask)
    jax.block_until_ready((ctx, attn))

    ctx_ref, attn_ref = _reference(Q, K, V, mask)
    assert ctx.shape == (B, H, Sq, D) and attn.shape == (B, H, Sq, Sk)
    assert jnp.allclose(ctx, ctx_ref, atol=2e-3, rtol=2e-3), "context mismatch"
    assert jnp.allclose(attn, attn_ref, atol=2e-3, rtol=2e-3), "attention mismatch"

    print("KERNEL_OK")
</pallas_src>

<mosaic_0001>
module attributes {stable_mosaic.version = 11 : i64} {
  func.func @sdpa_kernel(%arg0: i32, %arg1: i32, %arg2: memref<2x8x32xf32, #tpu.memory_space<vmem>>, %arg3: memref<2x8x32xf32, #tpu.memory_space<vmem>>, %arg4: memref<2x8x32xf32, #tpu.memory_space<vmem>>, %arg5: memref<2x8x8xi32, #tpu.memory_space<vmem>>, %arg6: memref<2x8x32xf32, #tpu.memory_space<vmem>>, %arg7: memref<2x8x8xf32, #tpu.memory_space<vmem>>) attributes {dimension_semantics = [#tpu.dimension_semantics<parallel>, #tpu.dimension_semantics<parallel>], iteration_bounds = array<i64: 4, 1>, scalar_prefetch = 0 : i64, scratch_operands = 0 : i64, tpu.core_type = #tpu.core_type<tc>, window_params = [{transform_indices = @transform_0, window_bounds = array<i64: 2, 8, 32>}, {transform_indices = @transform_1, window_bounds = array<i64: 2, 8, 32>}, {transform_indices = @transform_2, window_bounds = array<i64: 2, 8, 32>}, {transform_indices = @transform_3, window_bounds = array<i64: 2, 8, 8>}, {transform_indices = @transform_4, window_bounds = array<i64: 2, 8, 32>}, {transform_indices = @transform_5, window_bounds = array<i64: 2, 8, 8>}]} {
    %c0 = arith.constant 0 : index
    %c0_0 = arith.constant 0 : index
    %c0_1 = arith.constant 0 : index
    %0 = vector.load %arg2[%c0, %c0_0, %c0_1] : memref<2x8x32xf32, #tpu.memory_space<vmem>>, vector<2x8x32xf32>
    %c0_2 = arith.constant 0 : index
    %c0_3 = arith.constant 0 : index
    %c0_4 = arith.constant 0 : index
    %1 = vector.load %arg3[%c0_2, %c0_3, %c0_4] : memref<2x8x32xf32, #tpu.memory_space<vmem>>, vector<2x8x32xf32>
    %c0_5 = arith.constant 0 : index
    %c0_6 = arith.constant 0 : index
    %c0_7 = arith.constant 0 : index
    %2 = vector.load %arg4[%c0_5, %c0_6, %c0_7] : memref<2x8x32xf32, #tpu.memory_space<vmem>>, vector<2x8x32xf32>
    %c0_8 = arith.constant 0 : index
    %c0_9 = arith.constant 0 : index
    %c0_10 = arith.constant 0 : index
    %3 = vector.load %arg5[%c0_8, %c0_9, %c0_10] : memref<2x8x8xi32, #tpu.memory_space<vmem>>, vector<2x8x8xi32>
    %cst = arith.constant dense<0> : vector<2x8x8xi32>
    %4 = arith.cmpi ne, %3, %cst : vector<2x8x8xi32>
    %cst_11 = arith.constant dense<0.000000e+00> : vector<2x8x8xf32>
    %5 = tpu.matmul %0, %1, %cst_11 {dimension_numbers = #tpu.dot_dimension_numbers<[2], [2], [1], [1], [0, 0, 0, 1, 1, 1], [0], [0]>} : vector<2x8x32xf32>, vector<2x8x32xf32>, vector<2x8x8xf32> -> vector<2x8x8xf32>
    %cst_12 = arith.constant 0.176776692 : f32
    %6 = vector.broadcast %cst_12 : f32 to vector<2x8x8xf32>
    %7 = arith.mulf %5, %6 : vector<2x8x8xf32>
    %cst_13 = arith.constant -1.000000e+20 : f32
    %8 = vector.broadcast %cst_13 : f32 to vector<2x8x8xf32>
    %9 = arith.select %4, %8, %7 : vector<2x8x8xi1>, vector<2x8x8xf32>
    %cst_14 = arith.constant dense<0xFF800000> : vector<2x8xf32>
    %10 = vector.multi_reduction <maximumf>, %9, %cst_14 [2] : vector<2x8x8xf32> to vector<2x8xf32>
    %11 = vector.shape_cast %10 : vector<2x8xf32> to vector<2x8x1xf32>
    %12 = vector.broadcast %11 : vector<2x8x1xf32> to vector<2x8x8xf32>
    %13 = arith.subf %9, %12 : vector<2x8x8xf32>
    %14 = math.exp %13 : vector<2x8x8xf32>
    %cst_15 = arith.constant dense<0.000000e+00> : vector<2x8xf32>
    %15 = vector.multi_reduction <add>, %14, %cst_15 [2] : vector<2x8x8xf32> to vector<2x8xf32>
    %16 = vector.shape_cast %15 : vector<2x8xf32> to vector<2x8x1xf32>
    %17 = vector.broadcast %16 : vector<2x8x1xf32> to vector<2x8x8xf32>
    %18 = arith.divf %14, %17 : vector<2x8x8xf32>
    %c0_16 = arith.constant 0 : index
    %c0_17 = arith.constant 0 : index
    %c0_18 = arith.constant 0 : index
    %19 = vector.load %arg7[%c0_16, %c0_17, %c0_18] : memref<2x8x8xf32, #tpu.memory_space<vmem>>, vector<2x8x8xf32>
    tpu.vector_store %arg7[%c0_16, %c0_17, %c0_18], %18 {strides = array<i32>} : memref<2x8x8xf32, #tpu.memory_space<vmem>>, vector<2x8x8xf32>,
    %cst_19 = arith.constant dense<0.000000e+00> : vector<2x8x32xf32>
    %20 = tpu.matmul %18, %2, %cst_19 {dimension_numbers = #tpu.dot_dimension_numbers<[2], [1], [1], [2], [0, 0, 0, 1, 1, 2], [0], [0]>} : vector<2x8x8xf32>, vector<2x8x32xf32>, vector<2x8x32xf32> -> vector<2x8x32xf32>
    %c0_20 = arith.constant 0 : index
    %c0_21 = arith.constant 0 : index
    %c0_22 = arith.constant 0 : index
    %21 = vector.load %arg6[%c0_20, %c0_21, %c0_22] : memref<2x8x32xf32, #tpu.memory_space<vmem>>, vector<2x8x32xf32>
    tpu.vector_store %arg6[%c0_20, %c0_21, %c0_22], %20 {strides = array<i32>} : memref<2x8x32xf32, #tpu.memory_space<vmem>>, vector<2x8x32xf32>,
    return
  }
  func.func @transform_0(%arg0: i32, %arg1: i32) -> (i32, i32, i32) {
    %c0_i32 = arith.constant 0 : i32
    %c0_i32_0 = arith.constant 0 : i32
    return %arg0, %arg1, %c0_i32 : i32, i32, i32
  }
  func.func @transform_1(%arg0: i32, %arg1: i32) -> (i32, i32, i32) {
    %c0_i32 = arith.constant 0 : i32
    %c0_i32_0 = arith.constant 0 : i32
    %c0_i32_1 = arith.constant 0 : i32
    return %arg0, %c0_i32, %c0_i32_0 : i32, i32, i32
  }
  func.func @transform_2(%arg0: i32, %arg1: i32) -> (i32, i32, i32) {
    %c0_i32 = arith.constant 0 : i32
    %c0_i32_0 = arith.constant 0 : i32
    %c0_i32_1 = arith.constant 0 : i32
    return %arg0, %c0_i32, %c0_i32_0 : i32, i32, i32
  }
  func.func @transform_3(%arg0: i32, %arg1: i32) -> (i32, i32, i32) {
    %c0_i32 = arith.constant 0 : i32
    %c0_i32_0 = arith.constant 0 : i32
    return %arg0, %arg1, %c0_i32 : i32, i32, i32
  }
  func.func @transform_4(%arg0: i32, %arg1: i32) -> (i32, i32, i32) {
    %c0_i32 = arith.constant 0 : i32
    %c0_i32_0 = arith.constant 0 : i32
    return %arg0, %arg1, %c0_i32 : i32, i32, i32
  }
  func.func @transform_5(%arg0: i32, %arg1: i32) -> (i32, i32, i32) {
    %c0_i32 = arith.constant 0 : i32
    %c0_i32_0 = arith.constant 0 : i32
    return %arg0, %arg1, %c0_i32 : i32, i32, i32
  }
}

</mosaic_0001>

<bundles_post_ra>
// kernel: tpu_custom_call.1
= control target key start
LH: loop header
LB: loop body
LE: loop exit
PB: predicated region body
PF: predicated region fallthrough
CT: control target
= control target key end

     0   :  { %s1608_s0 = inlined_call_operand.vmem [shape: f32[8,8,32], index: 0, kind: input, shape index: {}]   ;;  %s1609_s1 = inlined_call_operand.hbm [shape: f32[8,8,32], index: 1, kind: input, shape index: {}]   ;;  %s1610_s2 = inlined_call_operand.hbm [shape: f32[8,8,32], index: 2, kind: input, shape index: {}]   ;;  %s1611_s3 = inlined_call_operand.vmem [shape: s32[8,8,8], index: 3, kind: input, shape index: {}]   ;;  %s1612_s4 = inlined_call_operand.hbm [shape: f32[8,8,32], index: 4, kind: output, shape index: {0}]   ;;  %s1613_s5 = inlined_call_operand.hbm [shape: f32[8,8,8], index: 5, kind: output, shape index: {1}]  }
   0x1   :  { %1617 = sst [smem:[#allocation14_spill]] %s1609_s1 }
   0x2   :  { %11 = vsyncpa [#allocation3], 0 }
   0x3   :  { %13 = vsyncpa [#allocation3 + $0x1], 0 }
   0x4   :  { %14 = vsyncpa [#allocation6], 0 }
   0x5   :  { %16 = vsyncpa [#allocation6 + $0x1], 0 }
   0x6   :  { %17 = vsyncpa [#allocation4], 0 }
   0x7   :  { %19 = vsyncpa [#allocation4 + $0x1], 0 }
   0x8   :  { %20 = vsyncpa [#allocation9], 0 }
   0x9   :  { %22 = vsyncpa [#allocation9 + $0x1], 0  ;;  %s1298_s18 = smov 0   ;;  %s1300_s19 = smov 0  }
   0xa   :  { %s1302_s20 = smov 0   ;;  %s1304_s21 = smov 0  }
   0xb   :  { %s1306_s22 = smov 0   ;;  %s1308_s23 = smov 0  }
   0xc LB: > { %s927_s24 = sadd.s32 4294967295, %s1256_s23   ;;  %s928_s25 = sadd.s32 4294967294, %s1256_s23   ;;  %s1256_s23 = sphi %s1308_s23, %s28_s23   ;;  %s1252_s22 = sphi %s1306_s22, %s1634_s22   ;;  %s1248_s21 = sphi %s1304_s21, %s1633_s21   ;;  %s1244_s20 = sphi %s1302_s20, %s1632_s20   ;;  %s1240_s19 = sphi %s1300_s19, %s1631_s19   ;;  %s1236_s18 = sphi %s1298_s18, %s1630_s18  }
   0xd   : > { %s40_s26 = sadd.s32 1, %s1252_s22  ;;  %s75_s27 = sadd.s32 1, %s1244_s20 }
   0xe   : > { %p42_p0 = scmp.ge.s32.totalorder %s40_s26, 4  ;;  %p82_p1 = scmp.ne.s32.totalorder %s1244_s20, %s1240_s19 }
   0xf   : > { %p83_p2 = scmp.eq.s32.totalorder %s1256_s23, 0  ;;  %p88_p3 = scmp.ne.s32.totalorder %s1240_s19, %s1236_s18 }
  0x10   : > { %s1636_s26 = smov (%p42_p0, %s40_s26), 0  ;;  %p89_p5 = scmp.eq.s32.totalorder %s927_s24, 0 }
  0x11   : > { %p1339_p4 = por %p83_p2, %p82_p1  ;;  %s72_s29 = ssub.s32 %s1252_s22, %s1636_s26 }
  0x12   : > { %p168_p6 = scmp.eq.s32.totalorder %s927_s24, 3  ;;  %p73_p7 = scmp.eq.s32.totalorder %s72_s29, 0 }
  0x13   : > { %p1345_p8 = por %p89_p5, %p88_p3  ;;  %p174_p10 = scmp.eq.s32.totalorder %s928_s25, 3 }
  0x14   : > { %p1349_p9 = por %p168_p6, %p82_p1  ;;  %p1014_p12 = scmp.lt.s32.totalorder %s1256_s23, 4 }
  0x15   : > { %s1619_s30 = scalar_select %p1345_p8, 1, 0 }
  0x16   : > { %s1620_s6 = scalar_select %p1349_p9, 1, 0 }
  0x17   : > { %s1354_s7 = scalar_select %p73_p7, %s1244_s20, %s75_s27  }
  0x18   : > { %p1356_p11 = por %p174_p10, %p88_p3  ;;  %s1362_s9 = sand.u32 1, %s1244_s20  }
  0x19   : > { %s931_s10 = sshll.u32 %s1362_s9, 4  ;;  %s960_s11 = sshll.u32 %s1252_s22, 8 }
  0x1a   : > { %s1621_s8 = scalar_select %p1356_p11, 1, 0 }
  0x1b   : > { %s1622_s1 = sld [smem:[#allocation14_spill]]  ;;  %s238_s15 = scalar_lea.vmem [#allocation2], %s931_s10 }
  0x1c   : > { %s245_s16 = sshll.u32 %s238_s15, 4  ;;  %p1379_p13 = pnand %p1014_p12, %p1339_p4  ;;  %s1375_s16 = int_to_ptr.vmem [resolvable:$true] %s245_s16 }
  0x1d   : > { %s235_s24 = scalar_lea.sflag [#allocation3], %s1362_s9 }
  0x1e   : > { %p1080_p2 = pneg %p1379_p13 }
  0x21   : > { %s1371_s14 = scalar_lea.hbm %s1622_s1, %s960_s11  ;;  %s1083_s28 = scalar_lea.hbm %s1622_s1, 1024 }
  0x22   : > { %s1078_s25 = scalar_lea.hbm %s1371_s14, 256  ;;  %p1084_p4 = scmp.lt.u32.totalorder %s1371_s14, %s1622_s1 }
  0x23   : > { %p1079_p1 = scmp.ne.s32.totalorder %s1371_s14, %s1078_s25  ;;  %p1085_p6 = scmp.lt.u32.totalorder %s1083_s28, %s1078_s25 }
  0x24   : > { %p1087_p10 = scmp.lt.u32.totalorder %s1078_s25, %s1371_s14 }
  0x25   : > { %p1081_p3 = pnand %p1080_p2, %p1079_p1  ;;  %p1086_p7 = por %p1085_p6, %p1084_p4 }
  0x27   : > { %p1082_p5 = pneg %p1081_p3  ;;  %p1088_p12 = por %p1087_p10, %p1086_p7 }
  0x29   : > { %p1089_p0 = pnand %p1088_p12, %p1082_p5 }
  0x2b   : > { %1092 = shalt.err (!%p1089_p0)
}
  0x2c   : > { %s1093_s15 = scalar_lea.vmem %s1375_s16, 256  ;;  %s1258_s27 = smov [#allocation2]  }
  0x2d   : > { %p1094_p1 = scmp.ne.s32.totalorder %s1375_s16, %s1093_s15  ;;  %s1098_s29 = sshll.u32 %s1258_s27, 4  ;;  %s1099_s29 = int_to_ptr.vmem [resolvable:$false] %s1098_s29 }
  0x2e   : > { %s1100_s12 = scalar_lea.vmem %s1099_s29, 512  ;;  %p1101_p9 = scmp.lt.s32.totalorder %s1375_s16, %s1099_s29 }
  0x2f   : > { %p1096_p3 = pnand %p1094_p1, %p1080_p2  ;;  %p1102_p4 = scmp.lt.s32.totalorder %s1100_s12, %s1093_s15 }
  0x31   : > { %p1097_p11 = pneg %p1096_p3  ;;  %p1103_p6 = por %p1102_p4, %p1101_p9 }
  0x33   : > { %p1104_p7 = pnand %p1103_p6, %p1097_p11 }
  0x35   : > { %1107 = shalt.err (!%p1104_p7)
}
  0x36   : > { %s1615_s25 = smov 128   ;;  %s1260_s28 = smov 8  }
  0x37   : > { %1003 = dma.hbm_to_vmem [thread:$0]  (!%p1379_p13), %s1371_s14, 256, %s1375_s16, %s235_s24, %s1615_s25, %s1615_s25, %s1260_s28  }
  0x38   : > { %p286_p9 = scmp.lt.s32.totalorder %s1256_s23, 5  ;;  %s1421_s27 = scalar_lea.hbm %s1610_s2, %s960_s11 }
  0x39   : > { %p1624_p11 = scmp.ge.s32.totalorder %s1256_s23, 1  ;;  %s259_s12 = scalar_lea.vmem [#allocation5], %s931_s10 }
  0x3a   : > { %s266_s1 = sshll.u32 %s259_s12, 4  ;;  %s256_s14 = scalar_lea.sflag [#allocation6], %s1362_s9  ;;  %s1431_s1 = int_to_ptr.vmem [resolvable:$true] %s266_s1 }
  0x3b   : > { %p1425_p0 = pnand %p1624_p11, %p286_p9  ;;  %s1108_s16 = scalar_lea.hbm %s1421_s27, 256 }
  0x3c   : > { %p1109_p5 = scmp.ne.s32.totalorder %s1421_s27, %s1108_s16  ;;  %s1113_s13 = scalar_lea.hbm %s1610_s2, 1024 }
  0x3d   : > { %p1114_p1 = scmp.lt.u32.totalorder %s1421_s27, %s1610_s2  ;;  %p1115_p3 = scmp.lt.u32.totalorder %s1113_s13, %s1108_s16 }
  0x3e   : > { %p1111_p10 = pnand %p1109_p5, %p1080_p2  ;;  %p1117_p6 = scmp.lt.u32.totalorder %s1108_s16, %s1421_s27 }
  0x3f   : > { %p1116_p4 = por %p1115_p3, %p1114_p1 }
  0x40   : > { %p1112_p12 = pneg %p1111_p10 }
  0x41   : > { %p1118_p7 = por %p1117_p6, %p1116_p4 }
  0x43   : > { %p1119_p9 = pnand %p1118_p7, %p1112_p12 }
  0x45   : > { %1122 = shalt.err (!%p1119_p9)
}
  0x46   : > { %s1123_s10 = scalar_lea.vmem %s1431_s1, 256  ;;  %s1261_s12 = smov [#allocation5]  }
  0x47   : > { %p1124_p11 = scmp.ne.s32.totalorder %s1431_s1, %s1123_s10  ;;  %s1128_s11 = sshll.u32 %s1261_s12, 4  ;;  %s1129_s11 = int_to_ptr.vmem [resolvable:$false] %s1128_s11 }
  0x48   : > { %s1130_s25 = scalar_lea.vmem %s1129_s11, 512  ;;  %p1131_p8 = scmp.lt.s32.totalorder %s1431_s1, %s1129_s11 }
  0x49   : > { %p1126_p5 = pnand %p1124_p11, %p1080_p2  ;;  %p1132_p1 = scmp.lt.s32.totalorder %s1130_s25, %s1123_s10 }
  0x4b   : > { %p1127_p10 = pneg %p1126_p5  ;;  %p1133_p3 = por %p1132_p1, %p1131_p8 }
  0x4d   : > { %p1134_p4 = pnand %p1133_p3, %p1127_p10 }
  0x4f   : > { %1137 = shalt.err (!%p1134_p4)
}
  0x50   : > { %s1626_s16 = smov 128   ;;  %290 = sbr.rel (%p1425_p0) target bundleno = 856 (0x358), region = 36 }
  0x51   : > { %1006 = dma.hbm_to_vmem [thread:$0]  (!%p1379_p13), %s1421_s27, 256, %s1431_s1, %s256_s14, %s1626_s16, %s1626_s16, %s1260_s28  }
  0x52   : > { %s1465_s24 = sand.u32 (!%p1425_p0), 1, %s1240_s19   ;;  %p1627_p8 = scmp.ne.s32.totalorder (!%p1425_p0), %s1619_s30, 0 }
  0x53   : > { %s1468_s13 = sshll.u32 (!%p1425_p0), %s1465_s24, 4  ;;  %s293_s17 = scalar_lea.sflag (!%p1425_p0), [#allocation3], %s1465_s24 }
  0x54   : > { %s296_s15 = scalar_lea.vmem (!%p1425_p0), [#allocation2], %s1468_s13 }
  0x57   : > { %1219 = dma.done.wait (%p1627_p8), %s293_s17, 256  }
  0x58   : > { %1221 = vsyncadd (%p1627_p8), %s293_s17, 4294967040  ;;  %s302_s1 = scalar_lea.sflag [#allocation6], %s1465_s24  ;;  %s305_s9 = scalar_lea.vmem [#allocation5], %s1468_s13 }
  0x59   : > { %1223 = dma.done.wait (%p1627_p8), %s302_s1, 256  }
  0x5a   : > { %1225 = vsyncadd (%p1627_p8), %s302_s1, 4294967040  ;;  %s942_s28 = sshll.u32 %s1248_s21, 1  ;;  %v1262_v0 = vmov 0.0   ;;  %vm1263_vm0 = vmmov 0   ;;  %vm390_vm1 = vcmask 261120   ;;  %v382_v1 = vld [vmem:[%s296_s15] sm:$0xff] }
  0x5b   : > { %972 = vmatprep.subr.mxu0 %v1262_v0  ;;  %974 = vmatprep.mubr.msk.f32.mxu0 %vm1263_vm0, %v1262_v0  ;;  %p359_p13 = scmp.lt.s32.totalorder %s942_s28, 7  ;;  %v383_v2 = vld [vmem:[%s296_s15 + $0x8] sm:$0xff]  ;;  %vm547_vm3 = vcmask 64512   ;;  %v384_v27 = vld [vmem:[%s305_s9] sm:$0xff]  ;;  %s357_s25 = scalar_lea.vmem [#allocation8], %s1468_s13 }
  0x5c   : > { %977 = vmatprep.subr.mxu1 %v1262_v0  ;;  %979 = vmatprep.mubr.msk.f32.mxu1 %vm1263_vm0, %v1262_v0  ;;  %v385_v28 = vld [vmem:[%s305_s9 + $0x8] sm:$0xff]  ;;  %s962_s16 = sshll.u32 %s1248_s21, 8  ;;  %s757_s17 = sshll.u32 %s357_s25, 4  ;;  %s1518_s17 = int_to_ptr.vmem [resolvable:$true] %s757_s17 }
  0x5d   : > { %s1638_s28 = smov (!%p359_p13, %s942_s28), 7  ;;  %973 = vmatpush3.xpose.msk.msra.mxu0 %vm390_vm1, %v382_v1  ;;  %978 = vmatpush3.xpose.msk.msra.mxu1 %vm390_vm1, %v383_v2  ;;  %s1516_s9 = scalar_lea.hbm %s1613_s5, %s962_s16 }
  0x5e   : > { %s943_s27 = sshll.u32 %s1638_s28, 3  ;;  %982 = vmatprep.subr.mxu0 %v1262_v0  ;;  %987 = vmatprep.subr.mxu1 %v1262_v0  ;;  %s726_s28 = scalar_lea.sflag [#allocation9], %s1465_s24 }
  0x5f   : > { %s365_s10 = scalar_lea.vmem %s1608_s0, %s943_s27  ;;  %s376_s11 = scalar_lea.vmem %s1611_s3, %s943_s27 }
  0x60   : > { %v380_v3 = vld [vmem:[%s365_s10] sm:$0xff]  ;;  %v381_v4 = vld [vmem:[%s365_s10 + $0x8] sm:$0xff]  ;;  %s1138_s27 = scalar_lea.vmem %s1518_s17, 256  ;;  %p1628_p0 = scmp.ne.s32.totalorder %s1620_s6, 0 }
  0x61   : > { %975 = vmatmul.mubr.msk.f32.vlgmr.msra.gmra.mrb[0].mxu0 %vm390_vm1, %v380_v3  ;;  %980 = vmatmul.mubr.msk.f32.vlgmr.msra.gmra.mrb[0].mxu1 %vm390_vm1, %v381_v4  ;;  %v386_v5 = vld [vmem:[%s376_s11] sm:$0xff]  ;;  %v387_v6 = vld [vmem:[%s376_s11 + $0x8] sm:$0xff]  ;;  %p1139_p2 = scmp.ne.s32.totalorder %s1518_s17, %s1138_s27  ;;  %s1264_s29 = smov [#allocation8]  }
  0x62   : > { %984 = vmatprep.mubr.msk.f32.mxu0 %vm1263_vm0, %v1262_v0  ;;  %989 = vmatprep.mubr.msk.f32.mxu1 %vm1263_vm0, %v1262_v0  ;;  %vm388_vm2 = vcmp.ne.s32.totalorder %v386_v5, 0  ;;  %vm389_vm4 = vcmp.ne.s32.totalorder %v387_v6, 0  ;;  %s1142_s14 = sshll.u32 %s1264_s29, 4  ;;  %s1143_s14 = int_to_ptr.vmem [resolvable:$false] %s1142_s14 }
  0x63   : > { %983 = vmatpush3.msra.mxu0 %v384_v27  ;;  %988 = vmatpush3.msra.mxu1 %v385_v28  ;;  %p1140_p12 = pnand %p1139_p2, %p1628_p0  ;;  %s1144_s10 = scalar_lea.vmem %s1143_s14, 512 }
  0x64   : > { %p1145_p7 = scmp.lt.s32.totalorder %s1518_s17, %s1143_s14  ;;  %p1146_p9 = scmp.lt.s32.totalorder %s1144_s10, %s1138_s27 }
  0x65   : > { %p1141_p6 = pneg %p1140_p12 }
  0x66   : > { %p1147_p11 = por %p1146_p9, %p1145_p7 }
  0x68   : > { %p1148_p5 = pnand %p1147_p11, %p1141_p6 }
 0x134   : > { %v463_v7 = vpop.f32.mrb[0].mxu0  ;;  %v539_v8 = vpop.f32.mrb[0].mxu1 }
 0x135   : > { %v543_v9 = vmul.f32 0.17677669, %v463_v7  ;;  %v976_v10 = vpop.f32.mrb[1].mxu0  ;;  %v544_v11 = vmul.f32 0.17677669, %v539_v8  ;;  %v981_v12 = vpop.f32.mrb[1].mxu1 }
 0x137   : > { %v545_v13 = vsel %vm388_vm2, -1e+20, %v543_v9  ;;  %v546_v14 = vsel %vm389_vm4, -1e+20, %v544_v11 }
 0x138   : > { %v548_v15 = vsel %vm547_vm3, %v545_v13, -inf  ;;  %v551_v16 = vsel %vm547_vm3, %v546_v14, -inf }
 0x139   : > { %549 = vmax.xlane.f32.xlu0 %v548_v15 }
 0x13d   : > { %552 = vmax.xlane.f32.xlu0 %v551_v16 }
 0x1c6   : > { %v550_v17 = vpop.xlane.xlu0 %549 }
 0x1c7   : > { %v554_v18 = vsub.f32 %v545_v13, %v550_v17 }
 0x1c9   : > { %v556_v19 = vmul.f32 1.442695, %v554_v18 }
 0x1ca   : > { %v553_v20 = vpop.xlane.xlu0 %552 }
 0x1cb   : > { %1070 = vpow2.f32 %v556_v19  ;;  %v555_v21 = vsub.f32 %v546_v14, %v553_v20 }
 0x1cd   : > { %v558_v22 = vmul.f32 1.442695, %v555_v21 }
 0x1cf   : > { %1072 = vpow2.f32 %v558_v22 }
 0x1d5   : > { %v1071_v23 = vpop.eup %1070 }
 0x1d6   : > { %v560_v24 = vsel %vm547_vm3, %v1071_v23, 0.0 }
 0x1d7   : > { %561 = vadd.xlane.f32.xlu1 %v560_v24 }
 0x1d9   : > { %v1073_v25 = vpop.eup %1072 }
 0x1da   : > { %v563_v26 = vsel %vm547_vm3, %v1073_v25, 0.0 }
 0x1db   : > { %564 = vadd.xlane.f32.xlu1 %v563_v26 }
 0x264   : > { %v562_v29 = vpop.xlane.xlu1 %561 }
 0x265   : > { %1074 = vrcp.f32 %v562_v29 }
 0x268   : > { %v565_v30 = vpop.xlane.xlu1 %564 }
 0x269   : > { %1076 = vrcp.f32 %v565_v30 }
 0x26f   : > { %v1075_v31 = vpop.eup %1074 }
 0x270   : > { %v567_v32 = vmul.f32 %v1075_v31, %v1071_v23 }
 0x272   : > { %985 = vmatmul.mubr.msk.f32.vlgmr.msra.gmra.mrb[2].mxu0 %vm547_vm3, %v567_v32  ;;  %570 = vst.msk [vmem:[%s357_s25] sm:$0xff] %vm547_vm3, %v567_v32 }
 0x273   : > { %v1077_v33 = vpop.eup %1076 }
 0x274   : > { %v569_v34 = vmul.f32 %v1077_v33, %v1073_v25 }
 0x276   : > { %990 = vmatmul.mubr.msk.f32.vlgmr.msra.gmra.mrb[2].mxu1 %vm547_vm3, %v569_v34  ;;  %571 = vst.msk [vmem:[%s357_s25 + $0x8] sm:$0xff] %vm547_vm3, %v569_v34 }
 0x277   : > { %1151 = shalt.err (!%p1148_p5)
}
 0x278   : > { %s1152_s30 = scalar_lea.hbm %s1516_s9, 256  ;;  %s1156_s25 = scalar_lea.hbm %s1613_s5, 1024 }
 0x279   : > { %p1153_p10 = scmp.ne.s32.totalorder %s1516_s9, %s1152_s30  ;;  %p1157_p4 = scmp.lt.u32.totalorder %s1516_s9, %s1613_s5 }
 0x27a   : > { %p1158_p8 = scmp.lt.u32.totalorder %s1156_s25, %s1152_s30  ;;  %p1160_p2 = scmp.lt.u32.totalorder %s1152_s30, %s1516_s9 }
 0x27b   : > { %p1154_p1 = pnand %p1153_p10, %p1628_p0 }
 0x27c   : > { %p1159_p13 = por %p1158_p8, %p1157_p4 }
 0x27d   : > { %p1155_p3 = pneg %p1154_p1 }
 0x27e   : > { %p1161_p12 = por %p1160_p2, %p1159_p13 }
 0x280   : > { %p1162_p6 = pnand %p1161_p12, %p1155_p3 }
 0x282   : > { %1165 = shalt.err (!%p1162_p6)
}
 0x283   : > { %s1265_s27 = smov 128   ;;  %s1266_s29 = smov 8  }
 0x284   : > { %997 = dma.vmem_to_hbm [thread:$0]  (%p1628_p0), %s1518_s17, 256, %s1516_s9, %s726_s28, %s1265_s27, %s1265_s27, %s1266_s29  }
 0x285   : > { %s350_s14 = scalar_lea.vmem [#allocation7], %s1468_s13  ;;  %s1556_s11 = scalar_lea.hbm %s1612_s4, %s962_s16 }
 0x286   : > { %s740_s10 = sshll.u32 %s350_s14, 4  ;;  %s721_s13 = scalar_lea.sflag [#allocation4], %s1465_s24  ;;  %s1549_s10 = int_to_ptr.vmem [resolvable:$true] %s740_s10 }
 0x287   : > { %s1166_s17 = scalar_lea.vmem %s1549_s10, 256  ;;  %s1267_s9 = smov [#allocation7]  }
 0x288   : > { %p1167_p7 = scmp.ne.s32.totalorder %s1549_s10, %s1166_s17  ;;  %s1170_s21 = sshll.u32 %s1267_s9, 4  ;;  %s1171_s21 = int_to_ptr.vmem [resolvable:$false] %s1170_s21 }
 0x289   : > { %s1172_s28 = scalar_lea.vmem %s1171_s21, 512  ;;  %p1173_p5 = scmp.lt.s32.totalorder %s1549_s10, %s1171_s21 }
 0x28a   : > { %p1168_p9 = pnand %p1167_p7, %p1628_p0  ;;  %p1174_p10 = scmp.lt.s32.totalorder %s1172_s28, %s1166_s17 }
 0x28c   : > { %p1169_p11 = pneg %p1168_p9  ;;  %p1175_p1 = por %p1174_p10, %p1173_p5 }
 0x28e   : > { %p1176_p3 = pnand %p1175_p1, %p1169_p11 }
 0x345   : > { %v641_v35 = vpop.f32.mrb[2].mxu0 }
 0x346   : > { %718 = vst.msk [vmem:[%s350_s14] sm:$0xff] %vm390_vm1, %v641_v35  ;;  %v986_v36 = vpop.f32.mrb[3].mxu0 }
 0x349   : > { %v714_v37 = vpop.f32.mrb[2].mxu1 }
 0x34a   : > { %719 = vst.msk [vmem:[%s350_s14 + $0x8] sm:$0xff] %vm390_vm1, %v714_v37  ;;  %v991_v38 = vpop.f32.mrb[3].mxu1 }
 0x34b   : > { %1179 = shalt.err (!%p1176_p3)
}
 0x34c   : > { %s1180_s16 = scalar_lea.hbm %s1556_s11, 256  ;;  %s1184_s1 = scalar_lea.hbm %s1612_s4, 1024 }
 0x34d   : > { %p1181_p4 = scmp.ne.s32.totalorder %s1556_s11, %s1180_s16  ;;  %p1185_p2 = scmp.lt.u32.totalorder %s1556_s11, %s1612_s4 }
 0x34e   : > { %p1186_p12 = scmp.lt.u32.totalorder %s1184_s1, %s1180_s16  ;;  %p1188_p7 = scmp.lt.u32.totalorder %s1180_s16, %s1556_s11 }
 0x34f   : > { %p1182_p8 = pnand %p1181_p4, %p1628_p0 }
 0x350   : > { %p1187_p6 = por %p1186_p12, %p1185_p2 }
 0x351   : > { %p1183_p13 = pneg %p1182_p8 }
 0x352   : > { %p1189_p9 = por %p1188_p7, %p1187_p6 }
 0x354   : > { %p1190_p11 = pnand %p1189_p9, %p1183_p13 }
 0x356   : > { %1193 = shalt.err (!%p1190_p11)
}
 0x357   : > { %996 = dma.vmem_to_hbm [thread:$0]  (%p1628_p0), %s1549_s10, 256, %s1556_s11, %s721_s13, %s1265_s27, %s1265_s27, %s1266_s29  }
 0x358 PF: > { %p1015_p5 = scmp.ge.s32.totalorder %s1256_s23, 2  ;;  %s772_s12 = sand.u32 1, %s1236_s18  }
 0x359   : > { %p1629_p10 = scmp.ne.s32.totalorder %s1621_s8, 0  ;;  %s773_s17 = scalar_lea.sflag [#allocation4], %s772_s12 }
 0x35b   : > { %p1008_p1 = pnand %p1015_p5, %p1629_p10 }
 0x35d   : > { %1227 = dma.done.wait (!%p1008_p1), %s773_s17, 256  }
 0x35e   : > { %1229 = vsyncadd (!%p1008_p1), %s773_s17, 4294967040  ;;  %s782_s6 = scalar_lea.sflag [#allocation9], %s772_s12 }
 0x35f   : > { %1231 = dma.done.wait (!%p1008_p1), %s782_s6, 256  }
 0x360   : > { %1233 = vsyncadd (!%p1008_p1), %s782_s6, 4294967040  ;;  %s28_s23 = sadd.s32 1, %s1256_s23   ;;  %s1630_s18 = smov %s1240_s19 }
 0x361   : > { %p25_p3 = scmp.ge.s32.totalorder %s28_s23, 6   ;;  %s1631_s19 = smov %s1244_s20 }
 0x362   : > { %s1632_s20 = smov %s1354_s7  ;;  %s1633_s21 = smov %s1252_s22 }
 0x363   : > { %s1634_s22 = smov %s1636_s26  ;;  %27 = sbr.rel (!%p25_p3) target bundleno = 12 (0xc), region = 117 }
 0x36a   :  { %787 = vsyncpa [#allocation3], 1 }
 0x36b   :  { %789 = vsyncpa [#allocation3 + $0x1], 1 }
 0x36c   :  { %790 = vsyncpa [#allocation6], 1 }
 0x36d   :  { %792 = vsyncpa [#allocation6 + $0x1], 1 }
 0x36e   :  { %793 = vsyncpa [#allocation4], 1 }
 0x36f   :  { %795 = vsyncpa [#allocation4 + $0x1], 1 }
 0x370   :  { %796 = vsyncpa [#allocation9], 1 }
 0x371   :  { %798 = vsyncpa [#allocation9 + $0x1], 1 }

</bundles_post_ra>
